<compile_context>
chip_gen: v5e
topology: v5e:2x2
jax: 0.10.0
libtpu: 0.0.40
codegen_flags: <defaults>
</compile_context>

<pallas_src>
import functools

import jax
import jax.numpy as jnp
from jax import lax
from jax.experimental import pallas as pl
from jax.experimental.pallas import tpu as pltpu


def _round_up(x, m):
    return ((x + m - 1) // m) * m


def _gpe_kernel(x_ref, w_ref, b_ref, out_ref, *, chunk):
    # x_ref:   (TN, D)       rows of x (rows on sublanes, D on lanes)
    # w_ref:   (1, 2*F*D)    [freq.ravel(), freq.ravel()]       (tiny, resident)
    # b_ref:   (1, 2*F*D)    [0]*F*D ++ [pi/2]*F*D              (tiny, resident)
    # out_ref: (TN, D_out)   D_out = D*(2F+1); columns = [x | sin(enc) | cos(enc)]
    tn, d = x_ref.shape
    ncopy = w_ref.shape[1] // d          # = 2*F

    # Hoist the broadcast operands out of the chunk loop.
    w = w_ref[...]                       # (1, 2*F*D)
    b = b_ref[...]                       # (1, 2*F*D)

    def body(c, carry):
        r0 = pl.multiple_of(c * chunk, chunk)
        xc = x_ref[pl.ds(r0, chunk), :]                      # (chunk, D)
        # Lane-tile x so lane m holds x[:, m % D] — matches torch's (F, D)
        # flattening order f*D + j.
        xcat = jnp.concatenate([xc] * ncopy, axis=1)         # (chunk, 2*F*D)
        arg = xcat * w + b                                   # [x*f | x*f + pi/2]
        s = jnp.sin(arg)                                     # one call => sin AND cos
        row = jnp.concatenate([xc, s], axis=1)               # (chunk, D_out)
        out_ref[pl.ds(r0, chunk), :] = row.astype(out_ref.dtype)
        return carry

    lax.fori_loop(0, tn // chunk, body, 0)


def gaussian_positional_encoding(x, frequencies, *, tn=4096, chunk=64, out_dtype=None):
    """x: (N, D), frequencies: (F, D) -> (N, D*(2F+1)), same values/order as torch."""
    n, d = x.shape
    f, d2 = frequencies.shape
    assert d == d2, "feature dims of x and frequencies must match"
    out_dtype = x.dtype if out_dtype is None else out_dtype
    d_out = d * (2 * f + 1)

    # ---- static tile-size selection ----
    tn = max(8, min(_round_up(tn, 8), _round_up(n, 8)))
    if pl.cdiv(n, tn) < 2 and n >= 16:
        # Keep >= 2 grid steps so the "parallel" axis can use both v7x TCs.
        tn = _round_up(pl.cdiv(n, 2), 8)
    chunk = max(8, min(_round_up(chunk, 8), tn))
    tn = _round_up(tn, chunk)            # kernel chunk loop needs tn % chunk == 0
    grid_n = pl.cdiv(n, tn)              # boundary block (if any) is clipped by Pallas

    # Argument tables for the fused sin/cos slab: lane m uses x[:, m % D].
    fr = frequencies.reshape(1, f * d).astype(jnp.float32)
    w = jnp.concatenate([fr, fr], axis=1)                                   # (1, 2FD)
    b = jnp.concatenate([jnp.zeros((1, f * d), jnp.float32),
                         jnp.full((1, f * d), 0.5 * jnp.pi, jnp.float32)],
                        axis=1)                                             # (1, 2FD)

    kernel = functools.partial(_gpe_kernel, chunk=chunk)
    return pl.pallas_call(
        kernel,
        out_shape=jax.ShapeDtypeStruct((n, d_out), out_dtype),
        grid=(grid_n,),
        in_specs=[
            pl.BlockSpec((tn, d), lambda i: (i, 0)),          # x row tile
            pl.BlockSpec((1, 2 * f * d), lambda i: (0, 0)),   # resident freq row
            pl.BlockSpec((1, 2 * f * d), lambda i: (0, 0)),   # resident phase row
        ],
        out_specs=pl.BlockSpec((tn, d_out), lambda i: (i, 0)),
        compiler_params=pltpu.CompilerParams(
            dimension_semantics=("parallel",),
        ),
    )(x, w, b)


def _reference(x, frequencies):
    enc = (x[:, None, :] * frequencies[None, :, :]).reshape(x.shape[0], -1)
    return jnp.concatenate([x, jnp.sin(enc), jnp.cos(enc)], axis=-1)


if __name__ == "__main__":
    key = jax.random.PRNGKey(0)
    k_x, k_f = jax.random.split(key)

    # Shapes consistent with the module: d_input=8, num_freqs=4, small batch.
    N, D, F = 16, 8, 4
    x = jax.random.normal(k_x, (N, D), dtype=jnp.float32)
    frequencies = jax.random.normal(k_f, (F, D), dtype=jnp.float32)  # torch.randn analogue

    out = jax.block_until_ready(gaussian_positional_encoding(x, frequencies))
    ref = _reference(x, frequencies)
    assert out.shape == (N, D * (2 * F + 1))
    assert jnp.allclose(out, ref, atol=1e-5, rtol=1e-5)

    # Slightly larger batch: exercises the multi-chunk inner loop and a 2-step grid.
    N2 = 512
    x2 = jax.random.normal(jax.random.PRNGKey(1), (N2, D), dtype=jnp.float32)
    out2 = jax.block_until_ready(gaussian_positional_encoding(x2, frequencies))
    ref2 = _reference(x2, frequencies)
    assert out2.shape == (N2, D * (2 * F + 1))
    assert jnp.allclose(out2, ref2, atol=1e-5, rtol=1e-5)

    print("KERNEL_OK")
</pallas_src>

<mosaic_0001>
module attributes {stable_mosaic.version = 11 : i64} {
  func.func @_gpe_kernel(%arg0: i32, %arg1: memref<8x8xf32, #tpu.memory_space<vmem>>, %arg2: memref<1x64xf32, #tpu.memory_space<vmem>>, %arg3: memref<1x64xf32, #tpu.memory_space<vmem>>, %arg4: memref<8x72xf32, #tpu.memory_space<vmem>>) attributes {dimension_semantics = [#tpu.dimension_semantics<parallel>], iteration_bounds = array<i64: 2>, scalar_prefetch = 0 : i64, scratch_operands = 0 : i64, tpu.core_type = #tpu.core_type<tc>, window_params = [{transform_indices = @transform_0, window_bounds = array<i64: 8, 8>}, {pipeline_mode = #tpu.pipeline_mode<synchronous>, transform_indices = @transform_1, window_bounds = array<i64: 1, 64>}, {pipeline_mode = #tpu.pipeline_mode<synchronous>, transform_indices = @transform_2, window_bounds = array<i64: 1, 64>}, {transform_indices = @transform_3, window_bounds = array<i64: 8, 72>}]} {
    %c0 = arith.constant 0 : index
    %c0_0 = arith.constant 0 : index
    %0 = vector.load %arg2[%c0, %c0_0] : memref<1x64xf32, #tpu.memory_space<vmem>>, vector<1x64xf32>
    %c0_1 = arith.constant 0 : index
    %c0_2 = arith.constant 0 : index
    %1 = vector.load %arg3[%c0_1, %c0_2] : memref<1x64xf32, #tpu.memory_space<vmem>>, vector<1x64xf32>
    %c0_i32 = arith.constant 0 : i32
    %c8_i32 = arith.constant 8 : i32
    %2 = arith.muli %c0_i32, %c8_i32 : i32
    %3 = tpu.assume_multiple %2, 8 : i32
    %4 = arith.index_cast %3 : i32 to index
    %c0_3 = arith.constant 0 : index
    %5 = vector.load %arg1[%4, %c0_3] : memref<8x8xf32, #tpu.memory_space<vmem>>, vector<8x8xf32>
    %6 = tpu.concatenate %5, %5, %5, %5, %5, %5, %5, %5 in 1 : vector<8x8xf32>, vector<8x8xf32>, vector<8x8xf32>, vector<8x8xf32>, vector<8x8xf32>, vector<8x8xf32>, vector<8x8xf32>, vector<8x8xf32> -> vector<8x64xf32>
    %7 = vector.broadcast %0 : vector<1x64xf32> to vector<8x64xf32>
    %8 = arith.mulf %6, %7 : vector<8x64xf32>
    %9 = vector.broadcast %1 : vector<1x64xf32> to vector<8x64xf32>
    %10 = arith.addf %8, %9 : vector<8x64xf32>
    %11 = math.sin %10 : vector<8x64xf32>
    %12 = tpu.concatenate %5, %11 in 1 : vector<8x8xf32>, vector<8x64xf32> -> vector<8x72xf32>
    %13 = arith.index_cast %3 : i32 to index
    %c0_4 = arith.constant 0 : index
    %14 = vector.load %arg4[%13, %c0_4] : memref<8x72xf32, #tpu.memory_space<vmem>>, vector<8x72xf32>
    tpu.vector_store %arg4[%13, %c0_4], %12 {strides = array<i32>} : memref<8x72xf32, #tpu.memory_space<vmem>>, vector<8x72xf32>,
    %c1_i32 = arith.constant 1 : i32
    return
  }
  func.func @transform_0(%arg0: i32) -> (i32, i32) {
    %c0_i32 = arith.constant 0 : i32
    %c0_i32_0 = arith.constant 0 : i32
    return %arg0, %c0_i32 : i32, i32
  }
  func.func @transform_1(%arg0: i32) -> (i32, i32) {
    %c0_i32 = arith.constant 0 : i32
    %c0_i32_0 = arith.constant 0 : i32
    %c0_i32_1 = arith.constant 0 : i32
    return %c0_i32, %c0_i32_0 : i32, i32
  }
  func.func @transform_2(%arg0: i32) -> (i32, i32) {
    %c0_i32 = arith.constant 0 : i32
    %c0_i32_0 = arith.constant 0 : i32
    %c0_i32_1 = arith.constant 0 : i32
    return %c0_i32, %c0_i32_0 : i32, i32
  }
  func.func @transform_3(%arg0: i32) -> (i32, i32) {
    %c0_i32 = arith.constant 0 : i32
    %c0_i32_0 = arith.constant 0 : i32
    return %arg0, %c0_i32 : i32, i32
  }
}

</mosaic_0001>

<bundles_post_ra>
// kernel: tpu_custom_call.1
= control target key start
LH: loop header
LB: loop body
LE: loop exit
PB: predicated region body
PF: predicated region fallthrough
CT: control target
= control target key end

     0   :  { %8 = vsyncpa [#allocation3], 0  ;;  %s778_s0 = inlined_call_operand.vmem [shape: f32[16,8], index: 0, kind: input, shape index: {}]   ;;  %s779_s1 = inlined_call_operand.vmem [shape: f32[1,64], index: 1, kind: input, shape index: {}]   ;;  %s780_s2 = inlined_call_operand.vmem [shape: f32[1,64], index: 2, kind: input, shape index: {}]   ;;  %s781_s3 = inlined_call_operand.hbm [shape: f32[16,72], index: 3, kind: output, shape index: {}]  }
   0x1   :  { %10 = vsyncpa [#allocation3 + $0x1], 0  ;;  %s616_s12 = smov 0   ;;  %s618_s13 = smov 0  }
   0x2   :  { %s620_s14 = smov 0   ;;  %s622_s15 = smov 0  }
   0x3 LB: > { %s637_s16 = sadd.s32 4294967295, %s580_s15   ;;  %s450_s17 = sadd.s32 4294967294, %s580_s15   ;;  %s580_s15 = sphi %s622_s15, %s787_s15   ;;  %s576_s14 = sphi %s620_s14, %s786_s14   ;;  %s572_s13 = sphi %s618_s13, %s785_s13   ;;  %s568_s12 = sphi %s616_s12, %s784_s12  }
   0x4   : > { %s641_s18 = sadd.s32 1, %s580_s15   ;;  %s91_s19 = sadd.s32 1, %s576_s14 }
   0x5   : > { %s88_s20 = ssub.s32 %s580_s15, %s641_s18  ;;  %p101_p0 = scmp.ne.s32.totalorder %s576_s14, %s572_s13 }
   0x6   : > { %p89_p1 = scmp.eq.s32.totalorder %s88_s20, 0  ;;  %p102_p2 = scmp.eq.s32.totalorder %s637_s16, 1 }
   0x7   : > { %p107_p3 = scmp.ne.s32.totalorder %s572_s13, %s568_s12  ;;  %p108_p4 = scmp.eq.s32.totalorder %s450_s17, 1 }
   0x8   : > { %s652_s21 = scalar_select %p89_p1, %s576_s14, %s91_s19  }
   0x9   : > { %p654_p5 = por %p102_p2, %p101_p0  ;;  %p658_p6 = por %p108_p4, %p107_p3 }
   0xa   : > { %p453_p7 = scmp.ge.s32.totalorder %s580_s15, 1  ;;  %p139_p8 = scmp.lt.s32.totalorder %s580_s15, 3 }
   0xc   : > { %p140_p9 = pnand %p453_p7, %p139_p8 }
   0xd   : > { %p162_p10 = scmp.lt.s32.totalorder (!%p140_p9), %s637_s16, 1  ;;  %s582_s29 = smov (!%p140_p9), 8  }
   0xe   : > { %143 = sbr.rel (%p140_p9) target bundleno = 375 (0x177), region = 32  ;;  %s583_s30 = smov (!%p140_p9), 24  }
   0xf   : > { %s584_s4 = smov (!%p140_p9), 40   ;;  %s585_s5 = smov (!%p140_p9), 16  }
  0x10   : > { %s586_s6 = smov (!%p140_p9), 32   ;;  %s587_s7 = smov (!%p140_p9), 48  }
  0x11   : > { %s588_s8 = smov (!%p140_p9), 56   ;;  %s159_s19 = sand.u32 (!%p140_p9), 1, %s572_s13  }
  0x12   : > { %s454_s20 = sshll.u32 (!%p140_p9), %s159_s19, 3 }
  0x13   : > { %s163_s24 = scalar_select %p162_p10, %s637_s16, 1  ;;  %vm191_vm0 = vcmask 64512   ;;  %vm193_vm1 = vcmask 130048   ;;  %vm195_vm2 = vcmask 195584   ;;  %vm197_vm3 = vcmask 261120  }
  0x14   : > { %vm199_vm4 = vcmask 326656   ;;  %vm201_vm5 = vcmask 392192   ;;  %vm203_vm6 = vcmask 457728   ;;  %v516_v12 = vld [vmem:[%s779_s1] ss:$0 sm:$0xff] }
  0x15   : > { %s455_s25 = sshll.u32 %s163_s24, 3  ;;  %v517_v14 = vld [vmem:[%s780_s2] ss:$0 sm:$0xff]  ;;  %v589_v30 = vmov 683565275   ;;  %s460_s24 = sshll.u32 %s637_s16, 3 }
  0x16   : > { %s165_s28 = scalar_lea.vmem %s778_s0, %s455_s25  ;;  %v590_v32 = vmov 2475754826   ;;  %v591_v35 = vmov 2131351028   ;;  %v592_v38 = vmov 2102212464   ;;  %s386_s27 = scalar_lea.hbm %s781_s3, %s460_s24 }
  0x17   : > { %v669_v0 = vld [vmem:[%s165_s28] sm:$0xff]  ;;  %v593_v41 = vmov 920167782   ;;  %v594_v44 = vmov 1326507024   ;;  %s161_s28 = scalar_lea.vmem [#allocation2], %s454_s20 }
  0x18   : > { %170 = vrot.lane.b32.xlu0 %v669_v0, %s582_s29  ;;  %176 = vrot.lane.b32.xlu1 %v669_v0, %s583_s30  ;;  %s388_s30 = sshll.u32 %s161_s28, 4  ;;  %s389_s30 = int_to_ptr.vmem [resolvable:$true] %s388_s30 }
  0x19   : > { %182 = vrot.lane.b32.xlu2 %v669_v0, %s584_s4  ;;  %s390_s4 = sshll.u32 %s386_s27, 4  ;;  %s391_s4 = int_to_ptr.hbm [resolvable:$true] %s390_s4 }
  0x20   : > { %173 = vrot.lane.b32.xlu0 %v669_v0, %s585_s5  ;;  %179 = vrot.lane.b32.xlu1 %v669_v0, %s586_s6  ;;  %s532_s5 = sshra.s32 %s391_s4, 4  ;;  %s533_s5 = int_to_ptr.hbm [resolvable:$true] %s532_s5 }
  0x21   : > { %185 = vrot.lane.b32.xlu2 %v669_v0, %s587_s7  ;;  %s534_s16 = scalar_lea.hbm %s533_s5, 8  ;;  %p539_p0 = scmp.lt.s32.totalorder %s533_s5, %s781_s3 }
  0x22   : > { %p535_p11 = scmp.ne.s32.totalorder %s533_s5, %s534_s16 }
  0x24   : > { %p536_p12 = pnand %p535_p11, %p654_p5 }
  0x26   : > { %p537_p13 = pneg %p536_p12 }
  0x28   : > { %188 = vrot.lane.b32.xlu0 %v669_v0, %s588_s8  ;;  %s538_s8 = scalar_lea.hbm %s781_s3, 16 }
  0x29   : > { %p540_p1 = scmp.lt.s32.totalorder %s538_s8, %s534_s16 }
  0x2b   : > { %p541_p2 = por %p540_p1, %p539_p0 }
  0x2d   : > { %p542_p3 = pnand %p541_p2, %p537_p13 }
  0x73   : > { %v183_v3 = vpop.permute.xlu2 %182 }
  0x7b   : > { %v186_v10 = vpop.permute.xlu2 %185 }
  0x8a   : > { %v171_v1 = vpop.permute.xlu0 %170  ;;  %v177_v2 = vpop.permute.xlu1 %176 }
  0x8b   : > { %v192_v4 = vsel %vm191_vm0, %v669_v0, %v171_v1 }
  0x92   : > { %v174_v5 = vpop.permute.xlu0 %173  ;;  %v180_v6 = vpop.permute.xlu1 %179 }
  0x93   : > { %v194_v7 = vsel %vm193_vm1, %v192_v4, %v174_v5 }
  0x94   : > { %v196_v8 = vsel %vm195_vm2, %v194_v7, %v177_v2 }
  0x95   : > { %v198_v9 = vsel %vm197_vm3, %v196_v8, %v180_v6 }
  0x96   : > { %v200_v11 = vsel %vm199_vm4, %v198_v9, %v183_v3 }
  0x97   : > { %v202_v13 = vsel %vm201_vm5, %v200_v11, %v186_v10 }
  0x9a   : > { %v189_v15 = vpop.permute.xlu0 %188 }
  0x9b   : > { %v204_v16 = vsel %vm203_vm6, %v202_v13, %v189_v15  ;;  %v595_v15 = vmov 0  }
  0x9c   : > { %v208_v17 = vmul.f32 %v516_v12, %v204_v16 }
  0x9e   : > { %v687_v18 = vadd.f32 %v517_v14, %v208_v17 }
  0xa0   : > { %v216_v19 = vand.u32 2139095040, %v687_v18  ;;  %v213_v22 = vand.u32 2147483647, %v687_v18  ;;  %vm215_vm4 = vcmp.lt.s32.totalorder %v687_v18, 0 }
  0xa2   : > { %v217_v20 = vshrl.u32 %v216_v19, 23  ;;  %v220_v25 = vand.u32 8388607, %v213_v22  ;;  %vm214_vm5 = vcmp.le.f32.partialorder %v213_v22, 0.7853982 }
  0xa4   : > { %v456_v21 = vadd.s32 4294967169, %v217_v20  ;;  %v221_v29 = vor.u32 8388608, %v220_v25 }
  0xa6   : > { %v223_v23 = vadd.s32 1, %v456_v21  ;;  %v704_v51 = vshll.u32 %v221_v29, 8 }
  0xa8   : > { %vm224_vm7 = vcmp.gt.s32.totalorder %v223_v23, 0  ;;  %v262_v60 = vand.u32 65535, %v704_v51  ;;  %v263_v61 = vshrl.u32 %v704_v51, 16 }
  0xa9   : > { %v225_v24 = vsel %vm224_vm7, %v223_v23, 0 }
  0xaa   : > { %v227_v26 = vand.u32 31, %v225_v24  ;;  %v695_v28 = vshrl.u32 %v225_v24, 5 }
  0xac   : > { %v693_v27 = vsub.s32 32, %v227_v26  ;;  %v230_v31 = vshll.u32 %v589_v30, %v227_v26  ;;  %v233_v33 = vshll.u32 %v590_v32, %v227_v26  ;;  %v236_v37 = vshll.u32 %v591_v35, %v227_v26 }
  0xad   : > { %v239_v40 = vshll.u32 %v592_v38, %v227_v26  ;;  %v242_v43 = vshll.u32 %v593_v41, %v227_v26  ;;  %vm245_vm8 = vcmp.lt.s32.totalorder %v695_v28, 1  ;;  %vm248_vm9 = vcmp.lt.s32.totalorder %v695_v28, 4 }
  0xae   : > { %v231_v34 = vshrl.u32 %v590_v32, %v693_v27  ;;  %v234_v36 = vshrl.u32 %v591_v35, %v693_v27  ;;  %v237_v39 = vshrl.u32 %v592_v38, %v693_v27  ;;  %v240_v42 = vshrl.u32 %v593_v41, %v693_v27 }
  0xaf   : > { %v243_v45 = vshrl.u32 %v594_v44, %v693_v27  ;;  %vm247_vm10 = vcmp.lt.s32.totalorder %v695_v28, 3  ;;  %vm246_vm11 = vcmp.lt.s32.totalorder %v695_v28, 2  ;;  %v229_v26 = vshrl.u32 %v589_v30, %v693_v27 }
  0xb0   : > { %v232_v46 = vor.u32 %v231_v34, %v230_v31  ;;  %v235_v47 = vor.u32 %v234_v36, %v233_v33  ;;  %v238_v48 = vor.u32 %v237_v39, %v236_v37  ;;  %v241_v49 = vor.u32 %v240_v42, %v239_v40 }
  0xb1   : > { %v244_v50 = vor.u32 %v243_v45, %v242_v43 }
  0xb2   : > { %v253_v52 = vsel %vm245_vm8, %v232_v46, %v235_v47  ;;  %v257_v53 = vsel %vm245_vm8, %v235_v47, %v238_v48  ;;  %v254_v54 = vsel %vm248_vm9, %v241_v49, 920167782  ;;  %v250_v23 = vsel %vm248_vm9, %v238_v48, 2102212464 }
  0xb3   : > { %v258_v55 = vsel %vm248_vm9, %v244_v50, 1326507024  ;;  %v255_v56 = vsel %vm247_vm10, %v238_v48, %v254_v54  ;;  %v249_v35 = vsel %vm245_vm8, %v229_v26, %v232_v46  ;;  %v251_v36 = vsel %vm247_vm10, %v235_v47, %v250_v23 }
  0xb4   : > { %v259_v57 = vsel %vm247_vm10, %v241_v49, %v258_v55  ;;  %v256_v58 = vsel %vm246_vm11, %v253_v52, %v255_v56  ;;  %v252_v27 = vsel %vm246_vm11, %v249_v35, %v251_v36  ;;  %vm356_vm9 = vweird.f32 %v687_v18 }
  0xb5   : > { %v260_v59 = vsel %vm246_vm11, %v257_v53, %v259_v57  ;;  %v286_v1 = vand.u32 65535, %v256_v58  ;;  %v287_v2 = vshrl.u32 %v256_v58, 16  ;;  %v306_v44 = vmul.u32 %v704_v51, %v252_v27 }
  0xb6   : > { %v264_v62 = vand.u32 65535, %v260_v59  ;;  %v265_v63 = vshrl.u32 %v260_v59, 16  ;;  %vm373_vm10 = vcmask 588800  }
  0xb7   : > { %v289_v5 = vmul.u32 %v287_v2, %v262_v60  ;;  %v290_v6 = vmul.u32 %v286_v1, %v263_v61  ;;  %v288_v10 = vmul.u32 %v286_v1, %v262_v60  ;;  %v291_v14 = vmul.u32 %v287_v2, %v263_v61 }
  0xb8   : > { %v267_v3 = vmul.u32 %v265_v63, %v262_v60  ;;  %v268_v4 = vmul.u32 %v264_v62, %v263_v61  ;;  %v266_v7 = vmul.u32 %v264_v62, %v262_v60  ;;  %v269_v9 = vmul.u32 %v265_v63, %v263_v61 }
  0xb9   : > { %v292_v11 = vshll.u32 %v289_v5, 16  ;;  %v294_v17 = vshll.u32 %v290_v6, 16  ;;  %v293_v33 = vshrl.u32 %v289_v5, 16  ;;  %v295_v39 = vshrl.u32 %v290_v6, 16 }
  0xba   : > { %v270_v8 = vshll.u32 %v267_v3, 16  ;;  %v272_v12 = vshll.u32 %v268_v4, 16  ;;  %v271_v29 = vshrl.u32 %v267_v3, 16  ;;  %v273_v37 = vshrl.u32 %v268_v4, 16 }
  0xbb   : > { %vm296_vm13 = vc.u32 %v288_v10, %v292_v11  ;;  %v298_v19 = vadd.s32 %v292_v11, %v288_v10 }
  0xbc   : > { %vm274_vm12 = vc.u32 %v266_v7, %v270_v8  ;;  %v276_v13 = vadd.s32 %v270_v8, %v266_v7  ;;  %v297_v21 = vsel %vm296_vm13, 1, %v595_v15 }
  0xbd   : > { %v275_v16 = vsel %vm274_vm12, 1, %v595_v15  ;;  %v299_v25 = vadd.s32 %v297_v21, %v291_v14  ;;  %vm300_vm15 = vc.u32 %v298_v19, %v294_v17  ;;  %v302_v42 = vadd.s32 %v298_v19, %v294_v17 }
  0xbe   : > { %v277_v20 = vadd.s32 %v275_v16, %v269_v9  ;;  %vm278_vm14 = vc.u32 %v276_v13, %v272_v12  ;;  %v301_v32 = vsel %vm300_vm15, 1, %v595_v15 }
  0xbf   : > { %v279_v24 = vsel %vm278_vm14, 1, %v595_v15  ;;  %v303_v34 = vadd.s32 %v301_v32, %v299_v25 }
  0xc0   : > { %v281_v31 = vadd.s32 %v279_v24, %v277_v20 }
  0xc1   : > { %v304_v40 = vadd.s32 %v303_v34, %v293_v33 }
  0xc2   : > { %v282_v38 = vadd.s32 %v281_v31, %v271_v29 }
  0xc3   : > { %v305_v30 = vadd.s32 %v304_v40, %v295_v39 }
  0xc4   : > { %v283_v41 = vadd.s32 %v282_v38, %v273_v37 }
  0xc5   : > { %v309_v43 = vadd.s32 1, %v305_v30 }
  0xc6   : > { %vm308_vm1 = vc.u32 %v283_v41, %v302_v42  ;;  %v307_v28 = vadd.s32 %v302_v42, %v283_v41 }
  0xc7   : > { %v310_v45 = vsel %vm308_vm1, %v309_v43, %v305_v30 }
  0xc8   : > { %v311_v48 = vadd.s32 %v310_v45, %v306_v44 }
  0xca   : > { %v312_v46 = vadd.s32 536870912, %v311_v48 }
  0xcc   : > { %v313_v49 = vshrl.u32 %v312_v46, 30 }
  0xce   : > { %v314_v50 = vshll.u32 %v313_v49, 30  ;;  %v337_v6 = vsub.s32 4, %v313_v49 }
  0xd0   : > { %v315_v47 = vsub.s32 %v311_v48, %v314_v50  ;;  %v338_v11 = vsel %vm215_vm4, %v337_v6, %v313_v49 }
  0xd1   : > { %v340_v14 = vsel %vm214_vm5, 0, %v338_v11 }
  0xd2   : > { %vm316_vm2 = vcmp.lt.s32.totalorder %v315_v47, 0  ;;  %v317_v52 = vsub.s32 0, %v315_v47  ;;  %v357_v20 = vadd.s32 3, %v340_v14 }
  0xd4   : > { %v318_v53 = vsel %vm316_vm2, %v317_v52, %v315_v47  ;;  %v358_v25 = vand.u32 3, %v357_v20 }
  0xd5   : > { %v319_v54 = vclz %v318_v53 }
  0xd6   : > { %vm360_vm6 = vcmp.eq.s32.totalorder %v358_v25, 0  ;;  %vm363_vm7 = vcmp.eq.s32.totalorder %v358_v25, 2  ;;  %vm359_vm8 = vcmp.lt.s32.totalorder %v358_v25, 2 }
  0xd7   : > { %v457_v55 = vadd.s32 4294967294, %v319_v54 }
  0xd9   : > { %vm458_vm3 = vcmp.lt.s32.totalorder %v457_v55, 0 }
  0xda   : > { %v322_v56 = vsel %vm458_vm3, 0, %v457_v55 }
  0xdb   : > { %v323_v57 = vsub.s32 32, %v322_v56  ;;  %v327_v58 = vsub.s32 4294967266, %v322_v56  ;;  %v324_v59 = vshll.u32 %v315_v47, %v322_v56 }
  0xdd   : > { %v325_v60 = vshrl.u32 %v307_v28, %v323_v57  ;;  %v328_v61 = vadd.s32 127, %v327_v58 }
  0xdf   : > { %v326_v51 = vor.u32 %v325_v60, %v324_v59  ;;  %v329_v62 = vshll.u32 %v328_v61, 23 }
  0xe1   : > { %v330_v63 = vor.u32 4788187, %v329_v62  ;;  %v333_v2 = vcvt.s32.f32 %v326_v51 }
  0xe3   : > { %v331_v1 = vand.u32 2147483647, %v330_v63 }
  0xe5   : > { %v334_v3 = vmul.f32 %v333_v2, %v331_v1 }
  0xe7   : > { %v335_v4 = vxor.u32 2147483648, %v334_v3 }
  0xe9   : > { %v336_v5 = vsel %vm215_vm4, %v335_v4, %v334_v3 }
  0xea   : > { %v339_v7 = vsel %vm214_vm5, %v687_v18, %v336_v5 }
  0xeb   : > { %v341_v8 = vmul.f32 %v339_v7, %v339_v7 }
  0xed   : > { %v342_v9 = vmul.f32 -0.001358992, %v341_v8  ;;  %v349_v10 = vmul.f32 -0.00019511016, %v341_v8 }
  0xef   : > { %v343_v12 = vadd.f32 0.041655596, %v342_v9  ;;  %v350_v13 = vadd.f32 0.008332121, %v349_v10 }
  0xf1   : > { %v344_v15 = vmul.f32 %v343_v12, %v341_v8  ;;  %v351_v16 = vmul.f32 %v350_v13, %v341_v8 }
  0xf3   : > { %v345_v17 = vadd.f32 -0.4999988, %v344_v15  ;;  %v352_v19 = vadd.f32 -0.16666654, %v351_v16 }
  0xf5   : > { %v346_v21 = vmul.f32 %v345_v17, %v341_v8  ;;  %v353_v23 = vmul.f32 %v352_v19, %v341_v8 }
  0xf7   : > { %v347_v22 = vadd.f32 1.0, %v346_v21  ;;  %v354_v24 = vadd.f32 1.0, %v353_v23 }
  0xf9   : > { %v355_v26 = vmul.f32 %v354_v24, %v339_v7  ;;  %v364_v29 = vxor.u32 2147483648, %v347_v22 }
  0xfb   : > { %v361_v31 = vxor.u32 2147483648, %v355_v26  ;;  %v365_v33 = vsel %vm363_vm7, %v364_v29, %v355_v26 }
  0xfd   : > { %v362_v32 = vsel %vm360_vm6, %v347_v22, %v361_v31 }
  0xfe   : > { %v366_v34 = vsel %vm359_vm8, %v362_v32, %v365_v33 }
  0xff   : > { %v367_v35 = vsel %vm356_vm9, nan, %v366_v34 }
 0x100   : > { %369 = vrot.lane.b32.xlu1 %v367_v35, %s582_s29  ;;  %s376_s29 = scalar_lea.sflag [#allocation3], %s159_s19 }
 0x172   : > { %v370_v36 = vpop.permute.xlu1 %369 }
 0x173   : > { %v372_v18 = vsel %vm191_vm0, %v669_v0, %v370_v36 }
 0x174   : > { %374 = vst.msk [vmem:[%s161_s28] sm:$0xff] %vm373_vm10, %v372_v18 }
 0x175   : > { %545 = shalt.err (!%p542_p3)
}
 0x176   : > { %463 = dma.vmem_to_hbm [thread:$0]  (%p654_p5), %s389_s30, 128, %s391_s4, %s376_s29  }
 0x177 PF: > { %p469_p4 = scmp.ge.s32.totalorder %s580_s15, 2  ;;  %s402_s11 = sand.u32 1, %s568_s12  }
 0x178   : > { %s403_s17 = scalar_lea.sflag [#allocation3], %s402_s11 }
 0x179   : > { %p466_p7 = pnand %p469_p4, %p658_p6 }
 0x17b   : > { %p467_p8 = pneg %p466_p7 }
 0x17d   : > { %563 = dma.done.wait (%p467_p8), %s403_s17, 128  }
 0x17e   : > { %565 = vsyncadd (%p467_p8), %s403_s17, 4294967168  ;;  %p13_p9 = scmp.ge.s32.totalorder %s641_s18, 4   ;;  %s784_s12 = smov %s572_s13 }
 0x17f   : > { %s785_s13 = smov %s576_s14  ;;  %s786_s14 = smov %s652_s21 }
 0x180   : > { %s787_s15 = smov %s641_s18  ;;  %15 = sbr.rel (!%p13_p9) target bundleno = 3 (0x3), region = 67 }
 0x185   :  { %409 = vsyncpa [#allocation3], 1 }
 0x186   :  { %411 = vsyncpa [#allocation3 + $0x1], 1 }

</bundles_post_ra>
